<compile_context>
chip_gen: v5e
topology: v5e:2x2
jax: 0.10.0
libtpu: 0.0.40
codegen_flags: <defaults>
</compile_context>

<pallas_src>
import functools

import jax
import jax.numpy as jnp
from jax.experimental import pallas as pl
from jax.experimental.pallas import tpu as pltpu

_BN_EPS = 1e-5
_LANE = 128                      # lane-dense feature padding
_TILE_M = 512                    # rows per grid step on the tiled path
_VMEM_CAP = 40 * 1024 * 1024     # stay well inside v7x's 64 MiB physical VMEM


# ------------------------------ small helpers ------------------------------- #

def _round_up(n, m):
    return ((n + m - 1) // m) * m


def _pad_last(a, mult=_LANE):
    pad = (-a.shape[-1]) % mult
    if pad:
        a = jnp.pad(a, [(0, 0)] * (a.ndim - 1) + [(0, pad)])
    return a


def _pad_2d(a, mult=_LANE):
    pr = (-a.shape[0]) % mult
    pc = (-a.shape[1]) % mult
    if pr or pc:
        a = jnp.pad(a, ((0, pr), (0, pc)))
    return a


def _nbytes(a):
    return int(a.size) * a.dtype.itemsize


def _vmem_limit(resident_bytes):
    # double-buffered tiles + compiler temporaries, capped for v7x headroom.
    return int(min(_VMEM_CAP, max(8 * 1024 * 1024, 4 * int(resident_bytes))))


# -------------------- path A: fused single-kernel (small M) ------------------ #

def _make_fused_mlp_kernel(num_hidden, m_true):
    """Ref order: x, (w, gamma, beta) * num_hidden, w_final, b_final, out."""
    inv_m = 1.0 / float(m_true)

    def kernel(*refs):
        x_ref = refs[0]
        o_ref = refs[-1]
        h = x_ref[...]                                           # (M, K0p) bf16
        idx = 1
        for _ in range(num_hidden):
            w_ref, g_ref, b_ref = refs[idx], refs[idx + 1], refs[idx + 2]
            idx += 3
            # Linear (no bias): bf16 x bf16 -> f32 accumulation on the MXU.
            y = jnp.dot(h, w_ref[...], preferred_element_type=jnp.float32)
            y = jnp.maximum(y, 0.0)                              # ReLU
            # One-pass training-mode BatchNorm1d stats (f32 accumulation).
            s = jnp.sum(y, axis=0, keepdims=True)
            ss = jnp.sum(y * y, axis=0, keepdims=True)
            mean = s * inv_m
            var = jnp.maximum(ss * inv_m - mean * mean, 0.0)
            scale = g_ref[...] * jax.lax.rsqrt(var + _BN_EPS)    # EUP rsqrt
            shift = b_ref[...] - mean * scale
            # Folded BN epilogue: one mul + one add per element.
            h = (y * scale + shift).astype(jnp.bfloat16)
        w_ref, b_ref = refs[idx], refs[idx + 1]
        o_ref[...] = (jnp.dot(h, w_ref[...], preferred_element_type=jnp.float32)
                      + b_ref[...])

    return kernel


def _forward_monolithic(h_p, prep):
    m = h_p.shape[0]
    num_hidden = len(prep["hidden"])
    flat = []
    for layer in prep["hidden"]:
        flat += [layer["w_t"], layer["gamma"], layer["beta"]]
    flat += [prep["final"]["w_t"], prep["final"]["b"]]
    out_dim_p = prep["final"]["w_t"].shape[1]

    # Static cost / VMEM bookkeeping.
    flops = 0
    k = h_p.shape[1]
    for layer in prep["hidden"]:
        n = layer["w_t"].shape[1]
        flops += 2 * m * k * n
        k = n
    flops += 2 * m * k * out_dim_p
    param_bytes = sum(_nbytes(a) for a in flat)
    max_w = max([h_p.shape[1]] + [a.shape[-1] for a in flat])
    out_bytes = m * out_dim_p * 4
    resident = _nbytes(h_p) + param_bytes + out_bytes + m * max_w * 6
    trans = num_hidden * prep["hidden"][0]["w_t"].shape[1] if num_hidden else 0
    cost = pl.CostEstimate(flops=flops, transcendentals=trans,
                           bytes_accessed=_nbytes(h_p) + param_bytes + out_bytes)

    vmem = pl.BlockSpec(memory_space=pltpu.MemorySpace.VMEM)
    return pl.pallas_call(
        _make_fused_mlp_kernel(num_hidden, m),
        out_shape=jax.ShapeDtypeStruct((m, out_dim_p), jnp.float32),
        in_specs=[vmem] * (1 + len(flat)),
        out_specs=vmem,
        compiler_params=pltpu.CompilerParams(
            vmem_limit_bytes=_vmem_limit(resident)),
        cost_estimate=cost,
    )(h_p, *flat)


# ------------------- path B: M-tiled per-layer kernels (large M) ------------- #

def _make_hidden_layer_kernel(tile_m, m_true, need_mask):
    def kernel(hin_ref, scale_ref, shift_ref, w_ref, y_ref, sum_ref, ssq_ref):
        i = pl.program_id(0)

        @pl.when(i == 0)
        def _init():
            sum_ref[...] = jnp.zeros_like(sum_ref)
            ssq_ref[...] = jnp.zeros_like(ssq_ref)

        # Fold the previous layer's BatchNorm into this layer's input
        # (identity scale/shift for the first layer).
        h = hin_ref[...].astype(jnp.float32) * scale_ref[...] + shift_ref[...]
        y = jnp.dot(h.astype(jnp.bfloat16), w_ref[...],
                    preferred_element_type=jnp.float32)
        y = jnp.maximum(y, 0.0)                                  # ReLU
        y_ref[...] = y.astype(y_ref.dtype)                       # bf16 stream-out

        if need_mask:  # keep zero-padded rows out of the batch statistics
            rows = i * tile_m + jax.lax.broadcasted_iota(jnp.int32, (tile_m, 1), 0)
            y = jnp.where(rows < m_true, y, 0.0)
        sum_ref[...] += jnp.sum(y, axis=0, keepdims=True)
        ssq_ref[...] += jnp.sum(y * y, axis=0, keepdims=True)

    return kernel


def _hidden_layer_call(h, scale, shift, w, tile_m, m_true):
    m_pad, kp = h.shape
    np_ = w.shape[1]
    num_tiles = m_pad // tile_m
    need_mask = (m_true % tile_m) != 0

    tile_bytes = (tile_m * kp * 2 + kp * np_ * 2 + 2 * kp * 4
                  + tile_m * np_ * 2 + 2 * np_ * 4)
    cost = pl.CostEstimate(
        flops=2 * m_pad * kp * np_, transcendentals=0,
        bytes_accessed=m_pad * kp * 2 + kp * np_ * 2 + m_pad * np_ * 2
        + 2 * kp * 4 + 2 * np_ * 4)

    return pl.pallas_call(
        _make_hidden_layer_kernel(tile_m, m_true, need_mask),
        grid=(num_tiles,),
        in_specs=[
            pl.BlockSpec((tile_m, kp), lambda i: (i, 0)),   # activation tile
            pl.BlockSpec((1, kp), lambda i: (0, 0)),        # prev-BN scale
            pl.BlockSpec((1, kp), lambda i: (0, 0)),        # prev-BN shift
            pl.BlockSpec((kp, np_), lambda i: (0, 0)),      # weight (VMEM resident)
        ],
        out_specs=(
            pl.BlockSpec((tile_m, np_), lambda i: (i, 0)),  # y tile (bf16)
            pl.BlockSpec((1, np_), lambda i: (0, 0)),       # sum   (accumulator)
            pl.BlockSpec((1, np_), lambda i: (0, 0)),       # sumsq (accumulator)
        ),
        out_shape=(
            jax.ShapeDtypeStruct((m_pad, np_), jnp.bfloat16),
            jax.ShapeDtypeStruct((1, np_), jnp.float32),
            jax.ShapeDtypeStruct((1, np_), jnp.float32),
        ),
        compiler_params=pltpu.CompilerParams(
            # stats accumulate across the M axis -> sequential grid.
            dimension_semantics=("arbitrary",),
            vmem_limit_bytes=_vmem_limit(tile_bytes)),
        cost_estimate=cost,
    )(h, scale, shift, w)


def _final_layer_kernel(hin_ref, scale_ref, shift_ref, w_ref, b_ref, o_ref):
    h = hin_ref[...].astype(jnp.float32) * scale_ref[...] + shift_ref[...]
    o_ref[...] = (jnp.dot(h.astype(jnp.bfloat16), w_ref[...],
                          preferred_element_type=jnp.float32) + b_ref[...])


def _final_layer_call(h, scale, shift, w, b, tile_m):
    m_pad, kp = h.shape
    op = w.shape[1]
    num_tiles = m_pad // tile_m

    tile_bytes = tile_m * kp * 2 + kp * op * 2 + 2 * kp * 4 + op * 4 + tile_m * op * 4
    cost = pl.CostEstimate(
        flops=2 * m_pad * kp * op, transcendentals=0,
        bytes_accessed=m_pad * kp * 2 + kp * op * 2 + m_pad * op * 4)

    return pl.pallas_call(
        _final_layer_kernel,
        grid=(num_tiles,),
        in_specs=[
            pl.BlockSpec((tile_m, kp), lambda i: (i, 0)),
            pl.BlockSpec((1, kp), lambda i: (0, 0)),
            pl.BlockSpec((1, kp), lambda i: (0, 0)),
            pl.BlockSpec((kp, op), lambda i: (0, 0)),
            pl.BlockSpec((1, op), lambda i: (0, 0)),
        ],
        out_specs=pl.BlockSpec((tile_m, op), lambda i: (i, 0)),
        out_shape=jax.ShapeDtypeStruct((m_pad, op), jnp.float32),
        compiler_params=pltpu.CompilerParams(
            # independent row tiles -> both v7x TensorCores usable.
            dimension_semantics=("parallel",),
            vmem_limit_bytes=_vmem_limit(tile_bytes)),
        cost_estimate=cost,
    )(h, scale, shift, w, b)


def _forward_tiled(h0, prep, m_true):
    tile_m = _TILE_M if m_true > _TILE_M else _round_up(m_true, 8)
    m_pad = _round_up(m_true, tile_m)
    if m_pad != m_true:
        h0 = jnp.pad(h0, ((0, m_pad - m_true), (0, 0)))   # zero rows (masked in stats)

    h = h0
    scale = jnp.ones((1, h0.shape[1]), jnp.float32)       # identity "previous BN"
    shift = jnp.zeros((1, h0.shape[1]), jnp.float32)
    inv_m = 1.0 / float(m_true)
    for layer in prep["hidden"]:
        y, s, ss = _hidden_layer_call(h, scale, shift, layer["w_t"], tile_m, m_true)
        # Tiny (1, N) stats -> scale/shift math between kernels; exact batch stats
        # over the TRUE row count (padded rows were masked out of s / ss).
        mean = s * inv_m
        var = jnp.maximum(ss * inv_m - mean * mean, 0.0)
        scale = layer["gamma"] * jax.lax.rsqrt(var + _BN_EPS)
        shift = layer["beta"] - mean * scale
        h = y
    return _final_layer_call(h, scale, shift, prep["final"]["w_t"],
                             prep["final"]["b"], tile_m)


# ------------------------------- model wrapper ------------------------------- #

def init_node_encoder_params(key, node_dim, hidden_dim, node_latent_dim, num_layers):
    """Deterministic parameter init (shapes follow the PyTorch module)."""
    params = {"hidden": [], "final": None}
    for i in range(num_layers - 1):
        input_dim = hidden_dim if i > 0 else node_dim
        key, wk = jax.random.split(key)
        # PyTorch Linear weight is (out, in); store transposed (in, out) for x @ W^T.
        w = jax.random.normal(wk, (hidden_dim, input_dim), jnp.float32)
        w = w * (1.0 / jnp.sqrt(jnp.float32(input_dim)))
        params["hidden"].append({
            "w_t": w.T,
            "gamma": jnp.ones((1, hidden_dim), jnp.float32),   # BatchNorm1d weight init
            "beta": jnp.zeros((1, hidden_dim), jnp.float32),   # BatchNorm1d bias init
        })
    key, wk, bk = jax.random.split(key, 3)
    w = jax.random.normal(wk, (node_latent_dim, hidden_dim), jnp.float32)
    w = w * (1.0 / jnp.sqrt(jnp.float32(hidden_dim)))
    b = jax.random.normal(bk, (1, node_latent_dim), jnp.float32) * 0.1
    params["final"] = {"w_t": w.T, "b": b}
    return params


def prepare_node_encoder_params(params):
    """Pad / cast parameters ONCE; reuse the result for every forward call."""
    prep = {"hidden": [], "final": None}
    for layer in params["hidden"]:
        prep["hidden"].append({
            "w_t": _pad_2d(layer["w_t"]).astype(jnp.bfloat16),
            "gamma": _pad_last(layer["gamma"]).astype(jnp.float32),
            "beta": _pad_last(layer["beta"]).astype(jnp.float32),
        })
    prep["final"] = {
        "w_t": _pad_2d(params["final"]["w_t"]).astype(jnp.bfloat16),
        "b": _pad_last(params["final"]["b"]).astype(jnp.float32),
    }
    return jax.tree_util.tree_map(jnp.asarray, prep)


def _use_tiled_path(m, h0, prep):
    leaves = jax.tree_util.tree_leaves(prep)
    param_bytes = sum(_nbytes(a) for a in leaves)
    max_w = max([h0.shape[1]] + [a.shape[-1] for a in leaves])
    act_bytes = m * max_w * 8                    # f32 y + bf16 h + headroom
    return m > _TILE_M or (_nbytes(h0) + param_bytes + act_bytes) > 4 * 1024 * 1024


def make_node_encoder_forward(node_latent_dim, force_path=None):
    """Build a jitted forward: x (b, n, node_dim) -> (b, n, node_latent_dim)."""

    @jax.jit
    def forward(x, prep):
        b, n, _ = x.shape
        m = b * n
        # Single pass: reshape + bf16 cast + lane-dense zero padding of the input.
        h0 = _pad_last(x.reshape(m, -1).astype(jnp.bfloat16))
        if force_path is None:
            use_tiled = _use_tiled_path(m, h0, prep)
        else:
            use_tiled = force_path == "tiled"
        out_p = _forward_tiled(h0, prep, m) if use_tiled else _forward_monolithic(h0, prep)
        return out_p[:m, :node_latent_dim].reshape(b, n, node_latent_dim)

    return forward


# Pure-JAX reference (correctness check only).
def node_encoder_reference(x, params, matmul_dtype=jnp.float32):
    b, n, _ = x.shape
    h = x.reshape(b * n, -1).astype(jnp.float32)
    for layer in params["hidden"]:
        y = jnp.dot(h.astype(matmul_dtype), layer["w_t"].astype(matmul_dtype),
                    preferred_element_type=jnp.float32)
        y = jnp.maximum(y, 0.0)
        mean = jnp.mean(y, axis=0, keepdims=True)
        var = jnp.mean((y - mean) ** 2, axis=0, keepdims=True)
        h = (y - mean) * jax.lax.rsqrt(var + _BN_EPS) * layer["gamma"] + layer["beta"]
        if matmul_dtype == jnp.bfloat16:
            h = h.astype(jnp.bfloat16).astype(jnp.float32)
    out = jnp.dot(h.astype(matmul_dtype), params["final"]["w_t"].astype(matmul_dtype),
                  preferred_element_type=jnp.float32) + params["final"]["b"]
    return out.reshape(b, n, -1)


if __name__ == "__main__":
    # Small shapes consistent with the module's forward.
    batch, node_cnt = 2, 8
    node_dim, hidden_dim, node_latent_dim, num_layers = 16, 32, 8, 3

    key = jax.random.PRNGKey(0)
    key, xk, pk = jax.random.split(key, 3)
    x = jax.random.normal(xk, (batch, node_cnt, node_dim), jnp.float32)
    params = init_node_encoder_params(pk, node_dim, hidden_dim,
                                      node_latent_dim, num_layers)
    prep = prepare_node_encoder_params(params)      # pad/cast once, reuse every call

    # --- small batch*node_cnt: fused single-kernel path ------------------------
    forward = make_node_encoder_forward(node_latent_dim)
    out = jax.block_until_ready(forward(x, prep))
    assert out.shape == (batch, node_cnt, node_latent_dim), out.shape

    ref_bf16 = node_encoder_reference(x, params, matmul_dtype=jnp.bfloat16)
    assert jnp.allclose(out, ref_bf16, atol=2e-2, rtol=2e-2), "mismatch vs bf16 reference"
    ref_f32 = node_encoder_reference(x, params, matmul_dtype=jnp.float32)
    assert jnp.allclose(out, ref_f32, atol=1e-1, rtol=1e-1), "mismatch vs f32 reference"

    # --- larger batch*node_cnt: M-tiled per-layer path (3 tiles, masked padding) --
    key, xk2 = jax.random.split(key)
    batch2, node_cnt2 = 6, 200                      # m = 1200 -> tiles of 512, pad masked
    x2 = jax.random.normal(xk2, (batch2, node_cnt2, node_dim), jnp.float32)
    forward_tiled = make_node_encoder_forward(node_latent_dim, force_path="tiled")
    out2 = jax.block_until_ready(forward_tiled(x2, prep))
    assert out2.shape == (batch2, node_cnt2, node_latent_dim), out2.shape

    ref2 = node_encoder_reference(x2, params, matmul_dtype=jnp.float32)
    assert jnp.allclose(out2, ref2, atol=1e-1, rtol=1e-1), "tiled path mismatch vs reference"

    print("KERNEL_OK")
</pallas_src>

<mosaic_0001>
module attributes {stable_mosaic.version = 11 : i64} {
  func.func @kernel(%arg0: memref<16x128xbf16, #tpu.memory_space<vmem>>, %arg1: memref<128x128xbf16, #tpu.memory_space<vmem>>, %arg2: memref<1x128xf32, #tpu.memory_space<vmem>>, %arg3: memref<1x128xf32, #tpu.memory_space<vmem>>, %arg4: memref<128x128xbf16, #tpu.memory_space<vmem>>, %arg5: memref<1x128xf32, #tpu.memory_space<vmem>>, %arg6: memref<1x128xf32, #tpu.memory_space<vmem>>, %arg7: memref<128x128xbf16, #tpu.memory_space<vmem>>, %arg8: memref<1x128xf32, #tpu.memory_space<vmem>>, %arg9: memref<16x128xf32, #tpu.memory_space<vmem>>) attributes {dimension_semantics = [], scalar_prefetch = 0 : i64, scratch_operands = 0 : i64, tpu.core_type = #tpu.core_type<tc>} {
    %c0 = arith.constant 0 : index
    %c0_0 = arith.constant 0 : index
    %0 = vector.load %arg0[%c0, %c0_0] : memref<16x128xbf16, #tpu.memory_space<vmem>>, vector<16x128xbf16>
    %c0_1 = arith.constant 0 : index
    %c0_2 = arith.constant 0 : index
    %1 = vector.load %arg1[%c0_1, %c0_2] : memref<128x128xbf16, #tpu.memory_space<vmem>>, vector<128x128xbf16>
    %cst = arith.constant dense<0.000000e+00> : vector<16x128xf32>
    %2 = tpu.matmul %0, %1, %cst {dimension_numbers = #tpu.dot_dimension_numbers<[1], [0], [0], [1], [0, 0, 1, 1], [], []>} : vector<16x128xbf16>, vector<128x128xbf16>, vector<16x128xf32> -> vector<16x128xf32>
    %cst_3 = arith.constant 0.000000e+00 : f32
    %3 = vector.broadcast %cst_3 : f32 to vector<16x128xf32>
    %4 = arith.maximumf %2, %3 : vector<16x128xf32>
    %cst_4 = arith.constant dense<0.000000e+00> : vector<128xf32>
    %5 = vector.multi_reduction <add>, %4, %cst_4 [0] : vector<16x128xf32> to vector<128xf32>
    %6 = vector.shape_cast %5 : vector<128xf32> to vector<1x128xf32>
    %7 = arith.mulf %4, %4 : vector<16x128xf32>
    %cst_5 = arith.constant dense<0.000000e+00> : vector<128xf32>
    %8 = vector.multi_reduction <add>, %7, %cst_5 [0] : vector<16x128xf32> to vector<128xf32>
    %9 = vector.shape_cast %8 : vector<128xf32> to vector<1x128xf32>
    %cst_6 = arith.constant 6.250000e-02 : f32
    %10 = vector.broadcast %cst_6 : f32 to vector<1x128xf32>
    %11 = arith.mulf %6, %10 : vector<1x128xf32>
    %cst_7 = arith.constant 6.250000e-02 : f32
    %12 = vector.broadcast %cst_7 : f32 to vector<1x128xf32>
    %13 = arith.mulf %9, %12 : vector<1x128xf32>
    %14 = arith.mulf %11, %11 : vector<1x128xf32>
    %15 = arith.subf %13, %14 : vector<1x128xf32>
    %cst_8 = arith.constant 0.000000e+00 : f32
    %16 = vector.broadcast %cst_8 : f32 to vector<1x128xf32>
    %17 = arith.maximumf %15, %16 : vector<1x128xf32>
    %c0_9 = arith.constant 0 : index
    %c0_10 = arith.constant 0 : index
    %18 = vector.load %arg2[%c0_9, %c0_10] : memref<1x128xf32, #tpu.memory_space<vmem>>, vector<1x128xf32>
    %cst_11 = arith.constant 9.99999974E-6 : f32
    %19 = vector.broadcast %cst_11 : f32 to vector<1x128xf32>
    %20 = arith.addf %17, %19 : vector<1x128xf32>
    %21 = math.rsqrt %20 : vector<1x128xf32>
    %22 = arith.mulf %18, %21 : vector<1x128xf32>
    %c0_12 = arith.constant 0 : index
    %c0_13 = arith.constant 0 : index
    %23 = vector.load %arg3[%c0_12, %c0_13] : memref<1x128xf32, #tpu.memory_space<vmem>>, vector<1x128xf32>
    %24 = arith.mulf %11, %22 : vector<1x128xf32>
    %25 = arith.subf %23, %24 : vector<1x128xf32>
    %26 = vector.broadcast %22 : vector<1x128xf32> to vector<16x128xf32>
    %27 = arith.mulf %4, %26 : vector<16x128xf32>
    %28 = vector.broadcast %25 : vector<1x128xf32> to vector<16x128xf32>
    %29 = arith.addf %27, %28 : vector<16x128xf32>
    %30 = arith.truncf %29 : vector<16x128xf32> to vector<16x128xbf16>
    %c0_14 = arith.constant 0 : index
    %c0_15 = arith.constant 0 : index
    %31 = vector.load %arg4[%c0_14, %c0_15] : memref<128x128xbf16, #tpu.memory_space<vmem>>, vector<128x128xbf16>
    %cst_16 = arith.constant dense<0.000000e+00> : vector<16x128xf32>
    %32 = tpu.matmul %30, %31, %cst_16 {dimension_numbers = #tpu.dot_dimension_numbers<[1], [0], [0], [1], [0, 0, 1, 1], [], []>} : vector<16x128xbf16>, vector<128x128xbf16>, vector<16x128xf32> -> vector<16x128xf32>
    %cst_17 = arith.constant 0.000000e+00 : f32
    %33 = vector.broadcast %cst_17 : f32 to vector<16x128xf32>
    %34 = arith.maximumf %32, %33 : vector<16x128xf32>
    %cst_18 = arith.constant dense<0.000000e+00> : vector<128xf32>
    %35 = vector.multi_reduction <add>, %34, %cst_18 [0] : vector<16x128xf32> to vector<128xf32>
    %36 = vector.shape_cast %35 : vector<128xf32> to vector<1x128xf32>
    %37 = arith.mulf %34, %34 : vector<16x128xf32>
    %cst_19 = arith.constant dense<0.000000e+00> : vector<128xf32>
    %38 = vector.multi_reduction <add>, %37, %cst_19 [0] : vector<16x128xf32> to vector<128xf32>
    %39 = vector.shape_cast %38 : vector<128xf32> to vector<1x128xf32>
    %cst_20 = arith.constant 6.250000e-02 : f32
    %40 = vector.broadcast %cst_20 : f32 to vector<1x128xf32>
    %41 = arith.mulf %36, %40 : vector<1x128xf32>
    %cst_21 = arith.constant 6.250000e-02 : f32
    %42 = vector.broadcast %cst_21 : f32 to vector<1x128xf32>
    %43 = arith.mulf %39, %42 : vector<1x128xf32>
    %44 = arith.mulf %41, %41 : vector<1x128xf32>
    %45 = arith.subf %43, %44 : vector<1x128xf32>
    %cst_22 = arith.constant 0.000000e+00 : f32
    %46 = vector.broadcast %cst_22 : f32 to vector<1x128xf32>
    %47 = arith.maximumf %45, %46 : vector<1x128xf32>
    %c0_23 = arith.constant 0 : index
    %c0_24 = arith.constant 0 : index
    %48 = vector.load %arg5[%c0_23, %c0_24] : memref<1x128xf32, #tpu.memory_space<vmem>>, vector<1x128xf32>
    %cst_25 = arith.constant 9.99999974E-6 : f32
    %49 = vector.broadcast %cst_25 : f32 to vector<1x128xf32>
    %50 = arith.addf %47, %49 : vector<1x128xf32>
    %51 = math.rsqrt %50 : vector<1x128xf32>
    %52 = arith.mulf %48, %51 : vector<1x128xf32>
    %c0_26 = arith.constant 0 : index
    %c0_27 = arith.constant 0 : index
    %53 = vector.load %arg6[%c0_26, %c0_27] : memref<1x128xf32, #tpu.memory_space<vmem>>, vector<1x128xf32>
    %54 = arith.mulf %41, %52 : vector<1x128xf32>
    %55 = arith.subf %53, %54 : vector<1x128xf32>
    %56 = vector.broadcast %52 : vector<1x128xf32> to vector<16x128xf32>
    %57 = arith.mulf %34, %56 : vector<16x128xf32>
    %58 = vector.broadcast %55 : vector<1x128xf32> to vector<16x128xf32>
    %59 = arith.addf %57, %58 : vector<16x128xf32>
    %60 = arith.truncf %59 : vector<16x128xf32> to vector<16x128xbf16>
    %c0_28 = arith.constant 0 : index
    %c0_29 = arith.constant 0 : index
    %61 = vector.load %arg7[%c0_28, %c0_29] : memref<128x128xbf16, #tpu.memory_space<vmem>>, vector<128x128xbf16>
    %cst_30 = arith.constant dense<0.000000e+00> : vector<16x128xf32>
    %62 = tpu.matmul %60, %61, %cst_30 {dimension_numbers = #tpu.dot_dimension_numbers<[1], [0], [0], [1], [0, 0, 1, 1], [], []>} : vector<16x128xbf16>, vector<128x128xbf16>, vector<16x128xf32> -> vector<16x128xf32>
    %c0_31 = arith.constant 0 : index
    %c0_32 = arith.constant 0 : index
    %63 = vector.load %arg8[%c0_31, %c0_32] : memref<1x128xf32, #tpu.memory_space<vmem>>, vector<1x128xf32>
    %64 = vector.broadcast %63 : vector<1x128xf32> to vector<16x128xf32>
    %65 = arith.addf %62, %64 : vector<16x128xf32>
    %c0_33 = arith.constant 0 : index
    %c0_34 = arith.constant 0 : index
    %66 = vector.load %arg9[%c0_33, %c0_34] : memref<16x128xf32, #tpu.memory_space<vmem>>, vector<16x128xf32>
    tpu.vector_store %arg9[%c0_33, %c0_34], %65 {strides = array<i32>} : memref<16x128xf32, #tpu.memory_space<vmem>>, vector<16x128xf32>,
    return
  }
}

</mosaic_0001>

<bundles_post_ra>
// kernel: forward.1
= control target key start
LH: loop header
LB: loop body
LE: loop exit
PB: predicated region body
PF: predicated region fallthrough
CT: control target
= control target key end

     0   :  { %14 = vsyncpa [#allocation3], 0  ;;  %s732_s0 = inlined_call_operand.vmem [shape: bf16[16,128], index: 0, kind: input, shape index: {}]   ;;  %s733_s1 = inlined_call_operand.hbm [shape: bf16[128,128], index: 1, kind: input, shape index: {}]   ;;  %s734_s2 = inlined_call_operand.vmem [shape: f32[1,128], index: 2, kind: input, shape index: {}]   ;;  %s735_s3 = inlined_call_operand.vmem [shape: f32[1,128], index: 3, kind: input, shape index: {}]   ;;  %s736_s4 = inlined_call_operand.hbm [shape: bf16[128,128], index: 4, kind: input, shape index: {}]   ;;  %s737_s5 = inlined_call_operand.vmem [shape: f32[1,128], index: 5, kind: input, shape index: {}]   ;;  %s738_s6 = inlined_call_operand.vmem [shape: f32[1,128], index: 6, kind: input, shape index: {}]   ;;  %s739_s7 = inlined_call_operand.hbm [shape: bf16[128,128], index: 7, kind: input, shape index: {}]   ;;  %s740_s8 = inlined_call_operand.vmem [shape: f32[1,128], index: 8, kind: input, shape index: {}]   ;;  %s741_s9 = inlined_call_operand.vmem [shape: f32[16,128], index: 9, kind: output, shape index: {}]  }
   0x1   :  { %15 = vsyncpa [#allocation5], 0  ;;  %s39_s11 = sshll.u32 %s736_s4, 4  ;;  %s644_s12 = smov [#allocation4]   ;;  %s40_s11 = int_to_ptr.hbm [resolvable:$true] %s39_s11 }
   0x2   :  { %s41_s13 = sshll.u32 %s644_s12, 4  ;;  %s22_s16 = sshll.u32 %s733_s1, 4  ;;  %s42_s13 = int_to_ptr.vmem [resolvable:$true] %s41_s13  ;;  %s23_s16 = int_to_ptr.hbm [resolvable:$true] %s22_s16 }
   0x3   :  { %s645_s17 = smov 64   ;;  %s646_s18 = smov 4  }
   0x4   :  { %47 = dma.hbm_to_vmem [thread:$0]  %s40_s11, 1024, %s42_s13, [#allocation5], %s645_s17, %s645_s17, %s646_s18  }
   0x5   :  { %s647_s19 = smov [#allocation2]   ;;  %s56_s23 = sshll.u32 %s739_s7, 4  ;;  %s57_s23 = int_to_ptr.hbm [resolvable:$true] %s56_s23 }
   0x6   :  { %s24_s20 = sshll.u32 %s647_s19, 4  ;;  %s648_s4 = smov [#allocation6]   ;;  %s25_s20 = int_to_ptr.vmem [resolvable:$true] %s24_s20 }
   0x7   :  { %30 = dma.hbm_to_vmem [thread:$0]  %s23_s16, 1024, %s25_s20, [#allocation3], %s645_s17, %s645_s17, %s646_s18  }
   0x8   :  { %s58_s24 = sshll.u32 %s648_s4, 4  ;;  %s59_s24 = int_to_ptr.vmem [resolvable:$true] %s58_s24 }
   0x9   :  { %64 = dma.hbm_to_vmem [thread:$0]  %s57_s23, 1024, %s59_s24, [#allocation5], %s645_s17, %s645_s17, %s646_s18  }
   0xa   :  { %640 = dma.done.wait [#allocation3], 1024  }
   0xb   :  { %641 = vsyncadd [#allocation3], 4294966272 }
   0xc   :  { %642 = dma.done.wait [#allocation5], 2048  }
   0xd   :  { %643 = vsyncadd [#allocation5], 4294965248  ;;  %v541_v0 = vld [vmem:[#allocation2 + $0x38] sm:$0xff]  ;;  %v540_v1 = vld [vmem:[#allocation2 + $0x30] sm:$0xff] }
   0xe   :  { %151 = vmatpush.bf16.msra.mxu0 %v541_v0  ;;  %v539_v2 = vld [vmem:[#allocation2 + $0x28] sm:$0xff]  ;;  %v538_v3 = vld [vmem:[#allocation2 + $0x20] sm:$0xff]  ;;  %v537_v4 = vld [vmem:[#allocation2 + $0x18] sm:$0xff] }
   0xf   :  { %v536_v5 = vld [vmem:[#allocation2 + $0x10] sm:$0xff]  ;;  %v535_v6 = vld [vmem:[#allocation2 + $0x8] sm:$0xff]  ;;  %v534_v7 = vld [vmem:[#allocation2] sm:$0xff] }
  0x10   :  { %v533_v8 = vld [vmem:[%s732_s0] sm:$0xff]  ;;  %v549_v10 = vld [vmem:[#allocation4 + $0x38] sm:$0xff]  ;;  %v548_v11 = vld [vmem:[#allocation4 + $0x30] sm:$0xff] }
  0x11   :  { %279 = vmatpush.bf16.msra.mxu1 %v549_v10  ;;  %v547_v14 = vld [vmem:[#allocation4 + $0x28] sm:$0xff]  ;;  %v546_v19 = vld [vmem:[#allocation4 + $0x20] sm:$0xff]  ;;  %v545_v24 = vld [vmem:[#allocation4 + $0x18] sm:$0xff] }
  0x12   :  { %152 = vmatpush.bf16.msra.mxu0 %v540_v1  ;;  %v544_v29 = vld [vmem:[#allocation4 + $0x10] sm:$0xff]  ;;  %v543_v34 = vld [vmem:[#allocation4 + $0x8] sm:$0xff]  ;;  %v542_v37 = vld [vmem:[#allocation4] sm:$0xff] }
  0x13   :  { %v188_v48 = vld [vmem:[%s734_s2] sm:$0x1]  ;;  %v557_v63 = vld [vmem:[#allocation6 + $0x38] sm:$0xff]  ;;  %v556_v0 = vld [vmem:[#allocation6 + $0x30] sm:$0xff] }
  0x14   :  { %v201_v52 = vld [vmem:[%s735_s3] sm:$0x1]  ;;  %411 = vmatpush.bf16.msra.mxu2 %v557_v63 }
  0x15   :  { %280 = vmatpush.bf16.msra.mxu1 %v548_v11 }
  0x16   :  { %153 = vmatpush.bf16.msra.mxu0 %v539_v2 }
  0x18   :  { %412 = vmatpush.bf16.msra.mxu2 %v556_v0 }
  0x19   :  { %281 = vmatpush.bf16.msra.mxu1 %v547_v14 }
  0x1a   :  { %154 = vmatpush.bf16.msra.mxu0 %v538_v3  ;;  %v555_v3 = vld [vmem:[#allocation6 + $0x28] sm:$0xff] }
  0x1c   :  { %413 = vmatpush.bf16.msra.mxu2 %v555_v3 }
  0x1d   :  { %282 = vmatpush.bf16.msra.mxu1 %v546_v19 }
  0x1e   :  { %155 = vmatpush.bf16.msra.mxu0 %v537_v4 }
  0x21   :  { %283 = vmatpush.bf16.msra.mxu1 %v545_v24 }
  0x22   :  { %156 = vmatpush.bf16.msra.mxu0 %v536_v5 }
  0x25   :  { %284 = vmatpush.bf16.msra.mxu1 %v544_v29 }
  0x26   :  { %157 = vmatpush.bf16.msra.mxu0 %v535_v6 }
  0x29   :  { %285 = vmatpush.bf16.msra.mxu1 %v543_v34 }
  0x2a   :  { %158 = vmatpush.bf16.msra.mxu0 %v534_v7 }
  0x2d   :  { %159 = vmatmul.bf16.vlgmr.msra.gmra.mxu0 %v533_v8  ;;  %286 = vmatpush.bf16.msra.mxu1 %v542_v37  ;;  %v554_v8 = vld [vmem:[#allocation6 + $0x20] sm:$0xff] }
  0x2e   :  { %414 = vmatpush.bf16.msra.mxu2 %v554_v8  ;;  %v316_v37 = vld [vmem:[%s737_s5] sm:$0x1] }
  0xaa   :  { %v160_v9 = vpop.f32.mrf.mxu0 }
  0xab   :  { %v165_v12 = vmax.f32 %v160_v9, 0.0 }
  0xad   :  { %v174_v16 = vmul.f32 %v165_v12, %v165_v12 }
  0xb2   :  { %v162_v13 = vpop.f32.mrf.mxu0 }
  0xb3   :  { %v166_v15 = vmax.f32 %v162_v13, 0.0  ;;  %v553_v13 = vld [vmem:[#allocation6 + $0x18] sm:$0xff] }
  0xb4   :  { %415 = vmatpush.bf16.msra.mxu2 %v553_v13 }
  0xb5   :  { %v167_v17 = vadd.f32 %v166_v15, %v165_v12  ;;  %v175_v18 = vmul.f32 %v166_v15, %v166_v15 }
  0xb7   :  { %v168_v20 = vrot.slane %v167_v17, 4  ;;  %v176_v21 = vadd.f32 %v175_v18, %v174_v16  ;;  %v552_v18 = vld [vmem:[#allocation6 + $0x10] sm:$0xff] }
  0xb8   :  { %416 = vmatpush.bf16.msra.mxu2 %v552_v18 }
  0xb9   :  { %v169_v22 = vadd.f32 %v168_v20, %v167_v17  ;;  %v177_v23 = vrot.slane %v176_v21, 4 }
  0xbb   :  { %v170_v25 = vrot.slane %v169_v22, 2  ;;  %v178_v26 = vadd.f32 %v177_v23, %v176_v21  ;;  %v551_v23 = vld [vmem:[#allocation6 + $0x8] sm:$0xff] }
  0xbc   :  { %417 = vmatpush.bf16.msra.mxu2 %v551_v23 }
  0xbd   :  { %v171_v27 = vadd.f32 %v170_v25, %v169_v22  ;;  %v179_v28 = vrot.slane %v178_v26, 2 }
  0xbf   :  { %v172_v30 = vrot.slane %v171_v27, 1  ;;  %v180_v31 = vadd.f32 %v179_v28, %v178_v26  ;;  %v550_v26 = vld [vmem:[#allocation6] sm:$0xff] }
  0xc0   :  { %418 = vmatpush.bf16.msra.mxu2 %v550_v26 }
  0xc1   :  { %v173_v32 = vadd.f32 %v172_v30, %v171_v27  ;;  %v181_v33 = vrot.slane %v180_v31, 1 }
  0xc3   :  { %v182_v35 = vadd.f32 %v181_v33, %v180_v31  ;;  %v183_v36 = vmul.f32 0.0625, %v173_v32 }
  0xc5   :  { %v184_v38 = vmul.f32 0.0625, %v182_v35  ;;  %v185_v39 = vmul.f32 %v183_v36, %v183_v36 }
  0xc7   :  { %v186_v40 = vsub.f32 %v184_v38, %v185_v39 }
  0xc9   :  { %v187_v41 = vmax.f32 %v186_v40, 0.0 }
  0xcb   :  { %v189_v42 = vadd.f32 1e-05, %v187_v41  ;;  %v329_v41 = vld [vmem:[%s738_s6] sm:$0x1] }
  0xcd   :  { %564 = vrsqrt.f32 %v189_v42  ;;  %vm196_vm1 = vweird.f32 %v189_v42 }
  0xd3   :  { %v565_v43 = vpop.eup %564 }
  0xd4   :  { %v191_v44 = vmul.f32 %v565_v43, %v189_v42  ;;  %vm197_vm0 = vweird.f32 %v565_v43 }
  0xd5   :  { %vm198_vm2 = vmor %vm196_vm1, %vm197_vm0 }
  0xd6   :  { %v192_v45 = vmul.f32 %v565_v43, %v191_v44 }
  0xd8   :  { %v193_v46 = vmul.f32 0.5, %v192_v45 }
  0xda   :  { %v194_v47 = vsub.f32 1.5, %v193_v46 }
  0xdc   :  { %v195_v49 = vmul.f32 %v565_v43, %v194_v47 }
  0xde   :  { %v199_v50 = vsel %vm198_vm2, %v565_v43, %v195_v49 }
  0xdf   :  { %v200_v51 = vmul.f32 %v199_v50, %v188_v48 }
  0xe1   :  { %v205_v53 = vperm.slane %v200_v51, 0  ;;  %v202_v54 = vmul.f32 %v200_v51, %v183_v36  ;;  %v563_v51 = vld [vmem:[%s740_s8] ss:$0 sm:$0xff] }
  0xe3   :  { %v203_v55 = vsub.f32 %v201_v52, %v202_v54  ;;  %v208_v56 = vmul.f32 %v205_v53, %v166_v15  ;;  %v207_v57 = vmul.f32 %v205_v53, %v165_v12 }
  0xe5   :  { %v210_v58 = vperm.slane %v203_v55, 0 }
  0xe7   :  { %v212_v59 = vadd.f32 %v210_v58, %v207_v57  ;;  %v213_v60 = vadd.f32 %v210_v58, %v208_v56 }
  0xe9   :  { %v214_v61 = vpack.c.bf16 %v213_v60, %v212_v59 }
  0xeb   :  { %287 = vmatmul.bf16.vlgmr.msra.gmra.mxu1 %v214_v61 }
 0x168   :  { %v288_v62 = vpop.f32.mrf.mxu1 }
 0x169   :  { %v293_v1 = vmax.f32 %v288_v62, 0.0 }
 0x16b   :  { %v302_v5 = vmul.f32 %v293_v1, %v293_v1 }
 0x170   :  { %v290_v2 = vpop.f32.mrf.mxu1 }
 0x171   :  { %v294_v4 = vmax.f32 %v290_v2, 0.0 }
 0x173   :  { %v295_v6 = vadd.f32 %v294_v4, %v293_v1  ;;  %v303_v7 = vmul.f32 %v294_v4, %v294_v4 }
 0x175   :  { %v296_v9 = vrot.slane %v295_v6, 4  ;;  %v304_v10 = vadd.f32 %v303_v7, %v302_v5 }
 0x177   :  { %v297_v11 = vadd.f32 %v296_v9, %v295_v6  ;;  %v305_v12 = vrot.slane %v304_v10, 4 }
 0x179   :  { %v298_v14 = vrot.slane %v297_v11, 2  ;;  %v306_v15 = vadd.f32 %v305_v12, %v304_v10 }
 0x17b   :  { %v299_v16 = vadd.f32 %v298_v14, %v297_v11  ;;  %v307_v17 = vrot.slane %v306_v15, 2 }
 0x17d   :  { %v300_v19 = vrot.slane %v299_v16, 1  ;;  %v308_v20 = vadd.f32 %v307_v17, %v306_v15 }
 0x17f   :  { %v301_v21 = vadd.f32 %v300_v19, %v299_v16  ;;  %v309_v22 = vrot.slane %v308_v20, 1 }
 0x181   :  { %v310_v24 = vadd.f32 %v309_v22, %v308_v20  ;;  %v311_v25 = vmul.f32 0.0625, %v301_v21 }
 0x183   :  { %v312_v27 = vmul.f32 0.0625, %v310_v24  ;;  %v313_v28 = vmul.f32 %v311_v25, %v311_v25 }
 0x185   :  { %v314_v29 = vsub.f32 %v312_v27, %v313_v28 }
 0x187   :  { %v315_v30 = vmax.f32 %v314_v29, 0.0 }
 0x189   :  { %v317_v31 = vadd.f32 1e-05, %v315_v30 }
 0x18b   :  { %566 = vrsqrt.f32 %v317_v31  ;;  %vm324_vm4 = vweird.f32 %v317_v31 }
 0x191   :  { %v567_v32 = vpop.eup %566 }
 0x192   :  { %v319_v33 = vmul.f32 %v567_v32, %v317_v31  ;;  %vm325_vm3 = vweird.f32 %v567_v32 }
 0x193   :  { %vm326_vm5 = vmor %vm324_vm4, %vm325_vm3 }
 0x194   :  { %v320_v34 = vmul.f32 %v567_v32, %v319_v33 }
 0x196   :  { %v321_v35 = vmul.f32 0.5, %v320_v34 }
 0x198   :  { %v322_v36 = vsub.f32 1.5, %v321_v35 }
 0x19a   :  { %v323_v38 = vmul.f32 %v567_v32, %v322_v36 }
 0x19c   :  { %v327_v39 = vsel %vm326_vm5, %v567_v32, %v323_v38 }
 0x19d   :  { %v328_v40 = vmul.f32 %v327_v39, %v316_v37 }
 0x19f   :  { %v333_v42 = vperm.slane %v328_v40, 0  ;;  %v330_v43 = vmul.f32 %v328_v40, %v311_v25 }
 0x1a1   :  { %v331_v44 = vsub.f32 %v329_v41, %v330_v43  ;;  %v336_v45 = vmul.f32 %v333_v42, %v294_v4  ;;  %v335_v46 = vmul.f32 %v333_v42, %v293_v1 }
 0x1a3   :  { %v338_v47 = vperm.slane %v331_v44, 0 }
 0x1a5   :  { %v340_v48 = vadd.f32 %v338_v47, %v335_v46  ;;  %v341_v49 = vadd.f32 %v338_v47, %v336_v45 }
 0x1a7   :  { %v342_v50 = vpack.c.bf16 %v341_v49, %v340_v48 }
 0x1a9   :  { %419 = vmatmul.bf16.vlgmr.msra.gmra.mxu2 %v342_v50 }
 0x22c   :  { %v420_v52 = vpop.f32.mrf.mxu2 }
 0x22d   :  { %v421_v53 = vadd.f32 %v563_v51, %v420_v52 }
 0x22f   :  { %425 = vst [vmem:[%s741_s9] sm:$0xff] %v421_v53 }
 0x234   :  { %v422_v54 = vpop.f32.mrf.mxu2 }
 0x235   :  { %v423_v55 = vadd.f32 %v563_v51, %v422_v54 }
 0x237   :  { %426 = vst [vmem:[%s741_s9 + $0x8] sm:$0xff] %v423_v55 }
 0x238   :  { %431 = vsyncpa [#allocation3], 1 }
 0x239   :  { %432 = vsyncpa [#allocation5], 1 }

</bundles_post_ra>
